<compile_context>
chip_gen: v6e
topology: v6e:2x2x1
jax: 0.10.0
libtpu: 0.0.40
codegen_flags: <defaults>
</compile_context>

<pallas_src>
import jax
import jax.numpy as jnp
import numpy as np
from jax.experimental import pallas as pl
from jax.experimental.pallas import tpu as pltpu

_LANE = 128
_MIN_TILE = 16          # bf16 sublane packing


def _round_up(x, m):
    return (x + m - 1) // m * m


def _disc_kernel(h_ref, hb_ref,
                 w1a_ref, w1b_ref, b1_ref,
                 w2_ref, b2_ref,
                 w3_ref, b3_ref,
                 o_ref):
    # Layer 1: split-W1 removes the torch.cat((H, H_), dim=1) lane concat.
    # Inputs already bf16 (cast in the wrapper); f32 accumulation on the MXU.
    x = (jnp.dot(h_ref[...], w1a_ref[...], preferred_element_type=jnp.float32)
         + jnp.dot(hb_ref[...], w1b_ref[...], preferred_element_type=jnp.float32)
         + b1_ref[...])
    x = jnp.maximum(x, 0.0)                       # dropout = identity (eval)

    # Layer 2
    x = jnp.dot(x.astype(jnp.bfloat16), w2_ref[...],
                preferred_element_type=jnp.float32) + b2_ref[...]
    x = jnp.maximum(x, 0.0)                       # dropout = identity (eval)

    # Layer 3 (output padded to 128 lanes -> lane-dense store)
    z = jnp.dot(x.astype(jnp.bfloat16), w3_ref[...],
                preferred_element_type=jnp.float32) + b3_ref[...]
    o_ref[...] = jax.nn.sigmoid(z).astype(o_ref.dtype)


def discriminator_forward(H, H_, kparams, *, tile_m_max=512):
    """H, H_: [B, num_hiddens] float32.  Returns [B, 2] float32."""
    w1a, w1b, b1, w2, b2, w3p, b3p = kparams
    B, nh = H.shape
    nh_p, d2_p = w1a.shape            # feature dims padded to 128-lane multiples

    # Stream activations as bf16; zero-pad the feature axis to nh_p lanes.
    def prep(a):
        a = a.astype(jnp.bfloat16)
        if nh_p != nh:
            a = jnp.pad(a, ((0, 0), (0, nh_p - nh)))
        return a
    H = prep(H)
    H_ = prep(H_)

    # Balanced batch tiling: minimize padded rows, tile_m multiple of 16,
    # grid >= 2 (when the batch allows) so both v7x TensorCores share the
    # "parallel" batch axis.
    n_tiles = pl.cdiv(B, tile_m_max)
    if B >= 2 * _MIN_TILE:
        n_tiles = max(n_tiles, 2)
    tile_m = _round_up(pl.cdiv(B, n_tiles), _MIN_TILE)
    Bp = _round_up(B, tile_m)
    if Bp != B:
        pad = ((0, Bp - B), (0, 0))
        H = jnp.pad(H, pad)
        H_ = jnp.pad(H_, pad)
    grid = (Bp // tile_m,)

    # Explicit VMEM budget: single-buffered weights + double-buffered
    # activation/output tiles + f32 intermediates, 1.5x headroom, capped at
    # v7x's 64 MiB physical per-TC VMEM (floor at the 16 MiB v5e default).
    weight_bytes = 2 * (w1a.size + w1b.size + w2.size + w3p.size)   # bf16
    bias_bytes = 4 * (b1.size + b2.size + b3p.size)                 # f32
    act_bytes = 2 * 2 * tile_m * nh_p * 2                           # H, H_ x 2 bufs
    out_bytes = 2 * tile_m * _LANE * 2                              # bf16 x 2 bufs
    tmp_bytes = tile_m * (d2_p + nh_p) * 4                          # f32 temporaries
    vmem_budget = int(1.5 * (weight_bytes + bias_bytes + act_bytes
                             + out_bytes + tmp_bytes)) + (2 << 20)
    vmem_budget = min(max(vmem_budget, 16 << 20), 64 << 20)

    act_spec = pl.BlockSpec((tile_m, nh_p), lambda i: (i, 0))
    out_spec = pl.BlockSpec((tile_m, _LANE), lambda i: (i, 0))

    def call(pinned_mode):
        pinned = lambda shape: pl.BlockSpec(shape, lambda i: (0, 0),
                                            pipeline_mode=pinned_mode)
        return pl.pallas_call(
            _disc_kernel,
            out_shape=jax.ShapeDtypeStruct((Bp, _LANE), jnp.bfloat16),
            grid=grid,
            in_specs=[
                act_spec, act_spec,                                       # H, H_
                pinned((nh_p, d2_p)), pinned((nh_p, d2_p)), pinned((1, d2_p)),
                pinned((d2_p, nh_p)), pinned((1, nh_p)),
                pinned((nh_p, _LANE)), pinned((1, _LANE)),
            ],
            out_specs=out_spec,
            compiler_params=pltpu.CompilerParams(
                dimension_semantics=("parallel",),
                vmem_limit_bytes=vmem_budget),
        )(H, H_, w1a, w1b, b1, w2, b2, w3p, b3p)

    try:
        # Constant index_map -> the second buffer would never be used; single
        # buffering halves resident weight VMEM.
        out = call(pl.Buffered(1))
    except Exception:
        # Fallback for runtimes that reject single-buffered pinned operands.
        out = call(None)

    return out[:B, :2].astype(jnp.float32)


def init_params(key, num_hiddens):
    """Deterministic init matching nn.Linear shapes (f32, [in, out] layout)."""
    d2 = num_hiddens * 2
    ks = jax.random.split(key, 6)

    def linear(kw, kb, fan_in, fan_out):
        bound = 1.0 / np.sqrt(fan_in)
        w = jax.random.uniform(kw, (fan_in, fan_out), jnp.float32, -bound, bound)
        b = jax.random.uniform(kb, (1, fan_out), jnp.float32, -bound, bound)
        return w, b

    w1, b1 = linear(ks[0], ks[1], d2, d2)            # out1: 2H -> 2H
    w2, b2 = linear(ks[2], ks[3], d2, num_hiddens)   # out2: 2H -> H
    w3, b3 = linear(ks[4], ks[5], num_hiddens, 2)    # out3: H -> 2
    return (w1, b1, w2, b2, w3, b3)


def prepare_kernel_params(params, num_hiddens):
    """Split W1, cast weights to bf16, zero-pad every dim to a 128 multiple."""
    w1, b1, w2, b2, w3, b3 = params
    nh = num_hiddens
    nh_p = _round_up(nh, _LANE)
    d2_p = _round_up(2 * nh, _LANE)

    def pad_w(w, rows, cols):
        out = jnp.zeros((rows, cols), jnp.bfloat16)
        return out.at[:w.shape[0], :w.shape[1]].set(w.astype(jnp.bfloat16))

    def pad_b(b, cols):
        out = jnp.zeros((1, cols), jnp.float32)
        return out.at[:, :b.shape[1]].set(b.astype(jnp.float32))

    # TODO(synk): optional fp8 (e4m3) weight quantization for v6e/v7x MXUs.
    w1a = pad_w(w1[:nh, :], nh_p, d2_p)   # consumes H
    w1b = pad_w(w1[nh:, :], nh_p, d2_p)   # consumes H_
    b1p = pad_b(b1, d2_p)
    w2p = pad_w(w2, d2_p, nh_p)
    b2p = pad_b(b2, nh_p)
    w3p = pad_w(w3, nh_p, _LANE)
    b3p = pad_b(b3, _LANE)
    return (w1a, w1b, b1p, w2p, b2p, w3p, b3p)


def _reference(H, H_, kparams, num_hiddens):
    """Plain-JAX reference emulating the kernel's bf16-operand / f32-accum math."""
    w1a, w1b, b1, w2, b2, w3p, b3p = kparams
    nh = num_hiddens
    f32 = lambda a: a.astype(jnp.float32)
    bf = lambda a: a.astype(jnp.bfloat16).astype(jnp.float32)
    x = bf(H) @ f32(w1a)[:nh] + bf(H_) @ f32(w1b)[:nh] + b1
    x = jnp.maximum(x, 0.0)
    x = jnp.maximum(bf(x) @ f32(w2) + b2, 0.0)
    z = bf(x) @ f32(w3p) + b3p
    return jax.nn.sigmoid(z)[:, :2]


def _run_case(batch, num_hiddens, tile_m_max):
    key = jax.random.PRNGKey(0)
    k_h, k_hb, k_p = jax.random.split(key, 3)
    H = jax.random.normal(k_h, (batch, num_hiddens), jnp.float32)
    H_ = jax.random.normal(k_hb, (batch, num_hiddens), jnp.float32)
    params = init_params(k_p, num_hiddens)
    kparams = prepare_kernel_params(params, num_hiddens)

    out = discriminator_forward(H, H_, kparams, tile_m_max=tile_m_max)
    out = jax.block_until_ready(out)

    ref = _reference(H, H_, kparams, num_hiddens)
    np.testing.assert_allclose(np.asarray(out), np.asarray(ref),
                               rtol=1e-2, atol=1e-2)


if __name__ == "__main__":
    # Small demo shape (grid = 1, features padded 32 -> 128, 64 -> 128).
    _run_case(batch=8, num_hiddens=32, tile_m_max=512)
    # Multi-step grid + batch-padding path + already lane-dense features:
    # B=50, nh=128 -> tile_m=16, grid=4, 14 padded rows.
    _run_case(batch=50, num_hiddens=128, tile_m_max=16)
    print("KERNEL_OK")
</pallas_src>

<mosaic_0001>
module attributes {stable_mosaic.version = 11 : i64} {
  func.func @_disc_kernel(%arg0: i32, %arg1: memref<16x128xbf16, #tpu.memory_space<vmem>>, %arg2: memref<16x128xbf16, #tpu.memory_space<vmem>>, %arg3: memref<128x128xbf16, #tpu.memory_space<vmem>>, %arg4: memref<128x128xbf16, #tpu.memory_space<vmem>>, %arg5: memref<1x128xf32, #tpu.memory_space<vmem>>, %arg6: memref<128x128xbf16, #tpu.memory_space<vmem>>, %arg7: memref<1x128xf32, #tpu.memory_space<vmem>>, %arg8: memref<128x128xbf16, #tpu.memory_space<vmem>>, %arg9: memref<1x128xf32, #tpu.memory_space<vmem>>, %arg10: memref<16x128xbf16, #tpu.memory_space<vmem>>) attributes {dimension_semantics = [#tpu.dimension_semantics<parallel>], iteration_bounds = array<i64: 1>, scalar_prefetch = 0 : i64, scratch_operands = 0 : i64, tpu.core_type = #tpu.core_type<tc>, window_params = [{transform_indices = @transform_0, window_bounds = array<i64: 16, 128>}, {transform_indices = @transform_1, window_bounds = array<i64: 16, 128>}, {pipeline_mode = #tpu.pipeline_mode<synchronous>, transform_indices = @transform_2, window_bounds = array<i64: 128, 128>}, {pipeline_mode = #tpu.pipeline_mode<synchronous>, transform_indices = @transform_3, window_bounds = array<i64: 128, 128>}, {pipeline_mode = #tpu.pipeline_mode<synchronous>, transform_indices = @transform_4, window_bounds = array<i64: 1, 128>}, {pipeline_mode = #tpu.pipeline_mode<synchronous>, transform_indices = @transform_5, window_bounds = array<i64: 128, 128>}, {pipeline_mode = #tpu.pipeline_mode<synchronous>, transform_indices = @transform_6, window_bounds = array<i64: 1, 128>}, {pipeline_mode = #tpu.pipeline_mode<synchronous>, transform_indices = @transform_7, window_bounds = array<i64: 128, 128>}, {pipeline_mode = #tpu.pipeline_mode<synchronous>, transform_indices = @transform_8, window_bounds = array<i64: 1, 128>}, {transform_indices = @transform_9, window_bounds = array<i64: 16, 128>}]} {
    %c0 = arith.constant 0 : index
    %c0_0 = arith.constant 0 : index
    %0 = vector.load %arg1[%c0, %c0_0] : memref<16x128xbf16, #tpu.memory_space<vmem>>, vector<16x128xbf16>
    %c0_1 = arith.constant 0 : index
    %c0_2 = arith.constant 0 : index
    %1 = vector.load %arg3[%c0_1, %c0_2] : memref<128x128xbf16, #tpu.memory_space<vmem>>, vector<128x128xbf16>
    %cst = arith.constant dense<0.000000e+00> : vector<16x128xf32>
    %2 = tpu.matmul %0, %1, %cst {dimension_numbers = #tpu.dot_dimension_numbers<[1], [0], [0], [1], [0, 0, 1, 1], [], []>} : vector<16x128xbf16>, vector<128x128xbf16>, vector<16x128xf32> -> vector<16x128xf32>
    %c0_3 = arith.constant 0 : index
    %c0_4 = arith.constant 0 : index
    %3 = vector.load %arg2[%c0_3, %c0_4] : memref<16x128xbf16, #tpu.memory_space<vmem>>, vector<16x128xbf16>
    %c0_5 = arith.constant 0 : index
    %c0_6 = arith.constant 0 : index
    %4 = vector.load %arg4[%c0_5, %c0_6] : memref<128x128xbf16, #tpu.memory_space<vmem>>, vector<128x128xbf16>
    %cst_7 = arith.constant dense<0.000000e+00> : vector<16x128xf32>
    %5 = tpu.matmul %3, %4, %cst_7 {dimension_numbers = #tpu.dot_dimension_numbers<[1], [0], [0], [1], [0, 0, 1, 1], [], []>} : vector<16x128xbf16>, vector<128x128xbf16>, vector<16x128xf32> -> vector<16x128xf32>
    %6 = arith.addf %2, %5 : vector<16x128xf32>
    %c0_8 = arith.constant 0 : index
    %c0_9 = arith.constant 0 : index
    %7 = vector.load %arg5[%c0_8, %c0_9] : memref<1x128xf32, #tpu.memory_space<vmem>>, vector<1x128xf32>
    %8 = vector.broadcast %7 : vector<1x128xf32> to vector<16x128xf32>
    %9 = arith.addf %6, %8 : vector<16x128xf32>
    %cst_10 = arith.constant 0.000000e+00 : f32
    %10 = vector.broadcast %cst_10 : f32 to vector<16x128xf32>
    %11 = arith.maximumf %9, %10 : vector<16x128xf32>
    %12 = arith.truncf %11 : vector<16x128xf32> to vector<16x128xbf16>
    %c0_11 = arith.constant 0 : index
    %c0_12 = arith.constant 0 : index
    %13 = vector.load %arg6[%c0_11, %c0_12] : memref<128x128xbf16, #tpu.memory_space<vmem>>, vector<128x128xbf16>
    %cst_13 = arith.constant dense<0.000000e+00> : vector<16x128xf32>
    %14 = tpu.matmul %12, %13, %cst_13 {dimension_numbers = #tpu.dot_dimension_numbers<[1], [0], [0], [1], [0, 0, 1, 1], [], []>} : vector<16x128xbf16>, vector<128x128xbf16>, vector<16x128xf32> -> vector<16x128xf32>
    %c0_14 = arith.constant 0 : index
    %c0_15 = arith.constant 0 : index
    %15 = vector.load %arg7[%c0_14, %c0_15] : memref<1x128xf32, #tpu.memory_space<vmem>>, vector<1x128xf32>
    %16 = vector.broadcast %15 : vector<1x128xf32> to vector<16x128xf32>
    %17 = arith.addf %14, %16 : vector<16x128xf32>
    %cst_16 = arith.constant 0.000000e+00 : f32
    %18 = vector.broadcast %cst_16 : f32 to vector<16x128xf32>
    %19 = arith.maximumf %17, %18 : vector<16x128xf32>
    %20 = arith.truncf %19 : vector<16x128xf32> to vector<16x128xbf16>
    %c0_17 = arith.constant 0 : index
    %c0_18 = arith.constant 0 : index
    %21 = vector.load %arg8[%c0_17, %c0_18] : memref<128x128xbf16, #tpu.memory_space<vmem>>, vector<128x128xbf16>
    %cst_19 = arith.constant dense<0.000000e+00> : vector<16x128xf32>
    %22 = tpu.matmul %20, %21, %cst_19 {dimension_numbers = #tpu.dot_dimension_numbers<[1], [0], [0], [1], [0, 0, 1, 1], [], []>} : vector<16x128xbf16>, vector<128x128xbf16>, vector<16x128xf32> -> vector<16x128xf32>
    %c0_20 = arith.constant 0 : index
    %c0_21 = arith.constant 0 : index
    %23 = vector.load %arg9[%c0_20, %c0_21] : memref<1x128xf32, #tpu.memory_space<vmem>>, vector<1x128xf32>
    %24 = vector.broadcast %23 : vector<1x128xf32> to vector<16x128xf32>
    %25 = arith.addf %22, %24 : vector<16x128xf32>
    %26 = arith.negf %25 : vector<16x128xf32>
    %27 = math.exp %26 : vector<16x128xf32>
    %cst_22 = arith.constant 1.000000e+00 : f32
    %28 = vector.broadcast %cst_22 : f32 to vector<16x128xf32>
    %29 = arith.addf %28, %27 : vector<16x128xf32>
    %30 = arith.divf %28, %29 : vector<16x128xf32>
    %31 = arith.truncf %30 : vector<16x128xf32> to vector<16x128xbf16>
    %c0_23 = arith.constant 0 : index
    %c0_24 = arith.constant 0 : index
    %32 = vector.load %arg10[%c0_23, %c0_24] : memref<16x128xbf16, #tpu.memory_space<vmem>>, vector<16x128xbf16>
    tpu.vector_store %arg10[%c0_23, %c0_24], %31 {strides = array<i32>} : memref<16x128xbf16, #tpu.memory_space<vmem>>, vector<16x128xbf16>,
    return
  }
  func.func @transform_0(%arg0: i32) -> (i32, i32) {
    %c0_i32 = arith.constant 0 : i32
    %c0_i32_0 = arith.constant 0 : i32
    return %arg0, %c0_i32 : i32, i32
  }
  func.func @transform_1(%arg0: i32) -> (i32, i32) {
    %c0_i32 = arith.constant 0 : i32
    %c0_i32_0 = arith.constant 0 : i32
    return %arg0, %c0_i32 : i32, i32
  }
  func.func @transform_2(%arg0: i32) -> (i32, i32) {
    %c0_i32 = arith.constant 0 : i32
    %c0_i32_0 = arith.constant 0 : i32
    %c0_i32_1 = arith.constant 0 : i32
    return %c0_i32, %c0_i32_0 : i32, i32
  }
  func.func @transform_3(%arg0: i32) -> (i32, i32) {
    %c0_i32 = arith.constant 0 : i32
    %c0_i32_0 = arith.constant 0 : i32
    %c0_i32_1 = arith.constant 0 : i32
    return %c0_i32, %c0_i32_0 : i32, i32
  }
  func.func @transform_4(%arg0: i32) -> (i32, i32) {
    %c0_i32 = arith.constant 0 : i32
    %c0_i32_0 = arith.constant 0 : i32
    %c0_i32_1 = arith.constant 0 : i32
    return %c0_i32, %c0_i32_0 : i32, i32
  }
  func.func @transform_5(%arg0: i32) -> (i32, i32) {
    %c0_i32 = arith.constant 0 : i32
    %c0_i32_0 = arith.constant 0 : i32
    %c0_i32_1 = arith.constant 0 : i32
    return %c0_i32, %c0_i32_0 : i32, i32
  }
  func.func @transform_6(%arg0: i32) -> (i32, i32) {
    %c0_i32 = arith.constant 0 : i32
    %c0_i32_0 = arith.constant 0 : i32
    %c0_i32_1 = arith.constant 0 : i32
    return %c0_i32, %c0_i32_0 : i32, i32
  }
  func.func @transform_7(%arg0: i32) -> (i32, i32) {
    %c0_i32 = arith.constant 0 : i32
    %c0_i32_0 = arith.constant 0 : i32
    %c0_i32_1 = arith.constant 0 : i32
    return %c0_i32, %c0_i32_0 : i32, i32
  }
  func.func @transform_8(%arg0: i32) -> (i32, i32) {
    %c0_i32 = arith.constant 0 : i32
    %c0_i32_0 = arith.constant 0 : i32
    %c0_i32_1 = arith.constant 0 : i32
    return %c0_i32, %c0_i32_0 : i32, i32
  }
  func.func @transform_9(%arg0: i32) -> (i32, i32) {
    %c0_i32 = arith.constant 0 : i32
    %c0_i32_0 = arith.constant 0 : i32
    return %arg0, %c0_i32 : i32, i32
  }
}

module attributes {stable_mosaic.version = 11 : i64} {
  func.func @_disc_kernel(%arg0: i32, %arg1: memref<16x128xbf16, #tpu.memory_space<vmem>>, %arg2: memref<16x128xbf16, #tpu.memory_space<vmem>>, %arg3: memref<128x128xbf16, #tpu.memory_space<vmem>>, %arg4: memref<128x128xbf16, #tpu.memory_space<vmem>>, %arg5: memref<1x128xf32, #tpu.memory_space<vmem>>, %arg6: memref<128x128xbf16, #tpu.memory_space<vmem>>, %arg7: memref<1x128xf32, #tpu.memory_space<vmem>>, %arg8: memref<128x128xbf16, #tpu.memory_space<vmem>>, %arg9: memref<1x128xf32, #tpu.memory_space<vmem>>, %arg10: memref<16x128xbf16, #tpu.memory_space<vmem>>) attributes {dimension_semantics = [#tpu.dimension_semantics<parallel>], iteration_bounds = array<i64: 1>, scalar_prefetch = 0 : i64, scratch_operands = 0 : i64, tpu.core_type = #tpu.core_type<tc>, window_params = [{transform_indices = @transform_0, window_bounds = array<i64: 16, 128>}, {transform_indices = @transform_1, window_bounds = array<i64: 16, 128>}, {pipeline_mode = #tpu.pipeline_mode<synchronous>, transform_indices = @transform_2, window_bounds = array<i64: 128, 128>}, {pipeline_mode = #tpu.pipeline_mode<synchronous>, transform_indices = @transform_3, window_bounds = array<i64: 128, 128>}, {pipeline_mode = #tpu.pipeline_mode<synchronous>, transform_indices = @transform_4, window_bounds = array<i64: 1, 128>}, {pipeline_mode = #tpu.pipeline_mode<synchronous>, transform_indices = @transform_5, window_bounds = array<i64: 128, 128>}, {pipeline_mode = #tpu.pipeline_mode<synchronous>, transform_indices = @transform_6, window_bounds = array<i64: 1, 128>}, {pipeline_mode = #tpu.pipeline_mode<synchronous>, transform_indices = @transform_7, window_bounds = array<i64: 128, 128>}, {pipeline_mode = #tpu.pipeline_mode<synchronous>, transform_indices = @transform_8, window_bounds = array<i64: 1, 128>}, {transform_indices = @transform_9, window_bounds = array<i64: 16, 128>}]} {
    %c0 = arith.constant 0 : index
    %c0_0 = arith.constant 0 : index
    %0 = vector.load %arg1[%c0, %c0_0] : memref<16x128xbf16, #tpu.memory_space<vmem>>, vector<16x128xbf16>
    %c0_1 = arith.constant 0 : index
    %c0_2 = arith.constant 0 : index
    %1 = vector.load %arg3[%c0_1, %c0_2] : memref<128x128xbf16, #tpu.memory_space<vmem>>, vector<128x128xbf16>
    %cst = arith.constant dense<0.000000e+00> : vector<16x128xf32>
    %2 = tpu.matmul %0, %1, %cst {dimension_numbers = #tpu.dot_dimension_numbers<[1], [0], [0], [1], [0, 0, 1, 1], [], []>} : vector<16x128xbf16>, vector<128x128xbf16>, vector<16x128xf32> -> vector<16x128xf32>
    %c0_3 = arith.constant 0 : index
    %c0_4 = arith.constant 0 : index
    %3 = vector.load %arg2[%c0_3, %c0_4] : memref<16x128xbf16, #tpu.memory_space<vmem>>, vector<16x128xbf16>
    %c0_5 = arith.constant 0 : index
    %c0_6 = arith.constant 0 : index
    %4 = vector.load %arg4[%c0_5, %c0_6] : memref<128x128xbf16, #tpu.memory_space<vmem>>, vector<128x128xbf16>
    %cst_7 = arith.constant dense<0.000000e+00> : vector<16x128xf32>
    %5 = tpu.matmul %3, %4, %cst_7 {dimension_numbers = #tpu.dot_dimension_numbers<[1], [0], [0], [1], [0, 0, 1, 1], [], []>} : vector<16x128xbf16>, vector<128x128xbf16>, vector<16x128xf32> -> vector<16x128xf32>
    %6 = arith.addf %2, %5 : vector<16x128xf32>
    %c0_8 = arith.constant 0 : index
    %c0_9 = arith.constant 0 : index
    %7 = vector.load %arg5[%c0_8, %c0_9] : memref<1x128xf32, #tpu.memory_space<vmem>>, vector<1x128xf32>
    %8 = vector.broadcast %7 : vector<1x128xf32> to vector<16x128xf32>
    %9 = arith.addf %6, %8 : vector<16x128xf32>
    %cst_10 = arith.constant 0.000000e+00 : f32
    %10 = vector.broadcast %cst_10 : f32 to vector<16x128xf32>
    %11 = arith.maximumf %9, %10 : vector<16x128xf32>
    %12 = arith.truncf %11 : vector<16x128xf32> to vector<16x128xbf16>
    %c0_11 = arith.constant 0 : index
    %c0_12 = arith.constant 0 : index
    %13 = vector.load %arg6[%c0_11, %c0_12] : memref<128x128xbf16, #tpu.memory_space<vmem>>, vector<128x128xbf16>
    %cst_13 = arith.constant dense<0.000000e+00> : vector<16x128xf32>
    %14 = tpu.matmul %12, %13, %cst_13 {dimension_numbers = #tpu.dot_dimension_numbers<[1], [0], [0], [1], [0, 0, 1, 1], [], []>} : vector<16x128xbf16>, vector<128x128xbf16>, vector<16x128xf32> -> vector<16x128xf32>
    %c0_14 = arith.constant 0 : index
    %c0_15 = arith.constant 0 : index
    %15 = vector.load %arg7[%c0_14, %c0_15] : memref<1x128xf32, #tpu.memory_space<vmem>>, vector<1x128xf32>
    %16 = vector.broadcast %15 : vector<1x128xf32> to vector<16x128xf32>
    %17 = arith.addf %14, %16 : vector<16x128xf32>
    %cst_16 = arith.constant 0.000000e+00 : f32
    %18 = vector.broadcast %cst_16 : f32 to vector<16x128xf32>
    %19 = arith.maximumf %17, %18 : vector<16x128xf32>
    %20 = arith.truncf %19 : vector<16x128xf32> to vector<16x128xbf16>
    %c0_17 = arith.constant 0 : index
    %c0_18 = arith.constant 0 : index
    %21 = vector.load %arg8[%c0_17, %c0_18] : memref<128x128xbf16, #tpu.memory_space<vmem>>, vector<128x128xbf16>
    %cst_19 = arith.constant dense<0.000000e+00> : vector<16x128xf32>
    %22 = tpu.matmul %20, %21, %cst_19 {dimension_numbers = #tpu.dot_dimension_numbers<[1], [0], [0], [1], [0, 0, 1, 1], [], []>} : vector<16x128xbf16>, vector<128x128xbf16>, vector<16x128xf32> -> vector<16x128xf32>
    %c0_20 = arith.constant 0 : index
    %c0_21 = arith.constant 0 : index
    %23 = vector.load %arg9[%c0_20, %c0_21] : memref<1x128xf32, #tpu.memory_space<vmem>>, vector<1x128xf32>
    %24 = vector.broadcast %23 : vector<1x128xf32> to vector<16x128xf32>
    %25 = arith.addf %22, %24 : vector<16x128xf32>
    %26 = arith.negf %25 : vector<16x128xf32>
    %27 = math.exp %26 : vector<16x128xf32>
    %cst_22 = arith.constant 1.000000e+00 : f32
    %28 = vector.broadcast %cst_22 : f32 to vector<16x128xf32>
    %29 = arith.addf %28, %27 : vector<16x128xf32>
    %30 = arith.divf %28, %29 : vector<16x128xf32>
    %31 = arith.truncf %30 : vector<16x128xf32> to vector<16x128xbf16>
    %c0_23 = arith.constant 0 : index
    %c0_24 = arith.constant 0 : index
    %32 = vector.load %arg10[%c0_23, %c0_24] : memref<16x128xbf16, #tpu.memory_space<vmem>>, vector<16x128xbf16>
    tpu.vector_store %arg10[%c0_23, %c0_24], %31 {strides = array<i32>} : memref<16x128xbf16, #tpu.memory_space<vmem>>, vector<16x128xbf16>,
    return
  }
  func.func @transform_0(%arg0: i32) -> (i32, i32) {
    %c0_i32 = arith.constant 0 : i32
    %c0_i32_0 = arith.constant 0 : i32
    return %arg0, %c0_i32 : i32, i32
  }
  func.func @transform_1(%arg0: i32) -> (i32, i32) {
    %c0_i32 = arith.constant 0 : i32
    %c0_i32_0 = arith.constant 0 : i32
    return %arg0, %c0_i32 : i32, i32
  }
  func.func @transform_2(%arg0: i32) -> (i32, i32) {
    %c0_i32 = arith.constant 0 : i32
    %c0_i32_0 = arith.constant 0 : i32
    %c0_i32_1 = arith.constant 0 : i32
    return %c0_i32, %c0_i32_0 : i32, i32
  }
  func.func @transform_3(%arg0: i32) -> (i32, i32) {
    %c0_i32 = arith.constant 0 : i32
    %c0_i32_0 = arith.constant 0 : i32
    %c0_i32_1 = arith.constant 0 : i32
    return %c0_i32, %c0_i32_0 : i32, i32
  }
  func.func @transform_4(%arg0: i32) -> (i32, i32) {
    %c0_i32 = arith.constant 0 : i32
    %c0_i32_0 = arith.constant 0 : i32
    %c0_i32_1 = arith.constant 0 : i32
    return %c0_i32, %c0_i32_0 : i32, i32
  }
  func.func @transform_5(%arg0: i32) -> (i32, i32) {
    %c0_i32 = arith.constant 0 : i32
    %c0_i32_0 = arith.constant 0 : i32
    %c0_i32_1 = arith.constant 0 : i32
    return %c0_i32, %c0_i32_0 : i32, i32
  }
  func.func @transform_6(%arg0: i32) -> (i32, i32) {
    %c0_i32 = arith.constant 0 : i32
    %c0_i32_0 = arith.constant 0 : i32
    %c0_i32_1 = arith.constant 0 : i32
    return %c0_i32, %c0_i32_0 : i32, i32
  }
  func.func @transform_7(%arg0: i32) -> (i32, i32) {
    %c0_i32 = arith.constant 0 : i32
    %c0_i32_0 = arith.constant 0 : i32
    %c0_i32_1 = arith.constant 0 : i32
    return %c0_i32, %c0_i32_0 : i32, i32
  }
  func.func @transform_8(%arg0: i32) -> (i32, i32) {
    %c0_i32 = arith.constant 0 : i32
    %c0_i32_0 = arith.constant 0 : i32
    %c0_i32_1 = arith.constant 0 : i32
    return %c0_i32, %c0_i32_0 : i32, i32
  }
  func.func @transform_9(%arg0: i32) -> (i32, i32) {
    %c0_i32 = arith.constant 0 : i32
    %c0_i32_0 = arith.constant 0 : i32
    return %arg0, %c0_i32 : i32, i32
  }
}

</mosaic_0001>

<bundles_post_ra>
// kernel: tpu_custom_call.1
= control target key start
LH: loop header
LB: loop body
LE: loop exit
PB: predicated region body
PF: predicated region fallthrough
CT: control target
= control target key end

     0   :  { %14 = vsyncpa [#allocation3], 0  ;;  %s1142_s0 = inlined_call_operand.hbm [shape: bf16[16,128], index: 0, kind: input, shape index: {}]   ;;  %s1143_s1 = inlined_call_operand.hbm [shape: bf16[16,128], index: 1, kind: input, shape index: {}]   ;;  %s1144_s2 = inlined_call_operand.hbm [shape: bf16[128,128], index: 2, kind: input, shape index: {}]   ;;  %s1145_s3 = inlined_call_operand.hbm [shape: bf16[128,128], index: 3, kind: input, shape index: {}]   ;;  %s1146_s4 = inlined_call_operand.vmem [shape: f32[1,128], index: 4, kind: input, shape index: {}]   ;;  %s1147_s5 = inlined_call_operand.hbm [shape: bf16[128,128], index: 5, kind: input, shape index: {}]   ;;  %s1148_s6 = inlined_call_operand.vmem [shape: f32[1,128], index: 6, kind: input, shape index: {}]   ;;  %s1149_s7 = inlined_call_operand.hbm [shape: bf16[128,128], index: 7, kind: input, shape index: {}]   ;;  %s1150_s8 = inlined_call_operand.vmem [shape: f32[1,128], index: 8, kind: input, shape index: {}]   ;;  %s1151_s9 = inlined_call_operand.hbm [shape: bf16[16,128], index: 9, kind: output, shape index: {}]  }
   0x1   :  { %15 = vsyncpa [#allocation6], 0 }
   0x2   :  { %16 = vsyncpa [#allocation9], 0 }
   0x3   :  { %17 = vsyncpa [#allocation12], 0 }
   0x4   :  { %18 = vsyncpa [#allocation4], 0  ;;  %s990_s30 = smov [#allocation5]   ;;  %s991_s11 = smov [#allocation8]  }
   0x5   :  { %s36_s10 = sshll.u32 %s990_s30, 4  ;;  %s60_s12 = sshll.u32 %s991_s11, 4  ;;  %s37_s10 = int_to_ptr.vmem [resolvable:$true] %s36_s10  ;;  %s61_s12 = int_to_ptr.vmem [resolvable:$true] %s60_s12 }
   0x6   :  { %s848_s13 = scalar_lea.vmem %s37_s10, 128  ;;  %p853_p1 = scmp.lt.s32.totalorder %s37_s10, %s37_s10 }
   0x7   :  { %p849_p0 = scmp.ne.s32.totalorder %s37_s10, %s848_s13  ;;  %p854_p2 = scmp.lt.s32.totalorder %s848_s13, %s848_s13 }
   0x9   :  { %p855_p3 = por %p854_p2, %p853_p1 }
   0xb   :  { %p856_p4 = pnand %p855_p3, %p849_p0 }
   0xd   :  { %859 = shalt.err (!%p856_p4)
}
   0xe   :  { %s992_s14 = smov 64   ;;  %s993_s15 = smov 4  }
   0xf   :  { %42 = dma.hbm_to_vmem [thread:$0]  %s1143_s1, 128, %s37_s10, [#allocation6], %s992_s14, %s992_s14, %s993_s15  }
  0x10   :  { %s868_s18 = scalar_lea.vmem %s61_s12, 1024  ;;  %p873_p6 = scmp.lt.s32.totalorder %s61_s12, %s61_s12 }
  0x11   :  { %p869_p5 = scmp.ne.s32.totalorder %s61_s12, %s868_s18  ;;  %p874_p7 = scmp.lt.s32.totalorder %s868_s18, %s868_s18 }
  0x13   :  { %p875_p8 = por %p874_p7, %p873_p6 }
  0x15   :  { %p876_p9 = pnand %p875_p8, %p869_p5 }
  0x17   :  { %879 = shalt.err (!%p876_p9)
}
  0x18   :  { %66 = dma.hbm_to_vmem [thread:$0]  %s1145_s3, 1024, %s61_s12, [#allocation9], %s992_s14, %s992_s14, %s993_s15  }
  0x19   :  { %s994_s21 = smov [#allocation2]   ;;  %s995_s23 = smov [#allocation7]  }
  0x1a   :  { %s24_s22 = sshll.u32 %s994_s21, 4  ;;  %s48_s24 = sshll.u32 %s995_s23, 4  ;;  %s25_s22 = int_to_ptr.vmem [resolvable:$true] %s24_s22  ;;  %s49_s24 = int_to_ptr.vmem [resolvable:$true] %s48_s24 }
  0x1b   :  { %s888_s1 = scalar_lea.vmem %s25_s22, 128  ;;  %p893_p11 = scmp.lt.s32.totalorder %s25_s22, %s25_s22 }
  0x1c   :  { %p889_p10 = scmp.ne.s32.totalorder %s25_s22, %s888_s1  ;;  %p894_p12 = scmp.lt.s32.totalorder %s888_s1, %s888_s1 }
  0x1e   :  { %p895_p13 = por %p894_p12, %p893_p11 }
  0x20   :  { %p896_p0 = pnand %p895_p13, %p889_p10 }
  0x22   :  { %899 = shalt.err (!%p896_p0)
}
  0x23   :  { %30 = dma.hbm_to_vmem [thread:$0]  %s1142_s0, 128, %s25_s22, [#allocation3], %s992_s14, %s992_s14, %s993_s15  }
  0x24   :  { %s908_s3 = scalar_lea.vmem %s49_s24, 1024  ;;  %p913_p2 = scmp.lt.s32.totalorder %s49_s24, %s49_s24 }
  0x25   :  { %p909_p1 = scmp.ne.s32.totalorder %s49_s24, %s908_s3  ;;  %p914_p3 = scmp.lt.s32.totalorder %s908_s3, %s908_s3 }
  0x27   :  { %p915_p4 = por %p914_p3, %p913_p2 }
  0x29   :  { %p916_p5 = pnand %p915_p4, %p909_p1 }
  0x2b   :  { %919 = shalt.err (!%p916_p5)
}
  0x2c   :  { %54 = dma.hbm_to_vmem [thread:$0]  %s1144_s2, 1024, %s49_s24, [#allocation6], %s992_s14, %s992_s14, %s993_s15  }
  0x2d   :  { %s996_s29 = smov [#allocation10]   ;;  %s997_s10 = smov [#allocation11]  }
  0x2e   :  { %s74_s30 = sshll.u32 %s996_s29, 4  ;;  %s88_s11 = sshll.u32 %s997_s10, 4  ;;  %s75_s30 = int_to_ptr.vmem [resolvable:$true] %s74_s30  ;;  %s89_s11 = int_to_ptr.vmem [resolvable:$true] %s88_s11 }
  0x2f   :  { %s928_s0 = scalar_lea.vmem %s75_s30, 1024  ;;  %p933_p7 = scmp.lt.s32.totalorder %s75_s30, %s75_s30 }
  0x30   :  { %p929_p6 = scmp.ne.s32.totalorder %s75_s30, %s928_s0  ;;  %p934_p8 = scmp.lt.s32.totalorder %s928_s0, %s928_s0 }
  0x32   :  { %p935_p9 = por %p934_p8, %p933_p7 }
  0x34   :  { %p936_p10 = pnand %p935_p9, %p929_p6 }
  0x36   :  { %939 = shalt.err (!%p936_p10)
}
  0x37   :  { %80 = dma.hbm_to_vmem [thread:$0]  %s1147_s5, 1024, %s75_s30, [#allocation9], %s992_s14, %s992_s14, %s993_s15  }
  0x38   :  { %s948_s2 = scalar_lea.vmem %s89_s11, 1024  ;;  %p953_p12 = scmp.lt.s32.totalorder %s89_s11, %s89_s11 }
  0x39   :  { %p949_p11 = scmp.ne.s32.totalorder %s89_s11, %s948_s2  ;;  %p954_p13 = scmp.lt.s32.totalorder %s948_s2, %s948_s2 }
  0x3b   :  { %p955_p0 = por %p954_p13, %p953_p12 }
  0x3d   :  { %p956_p1 = pnand %p955_p0, %p949_p11 }
  0x3f   :  { %959 = shalt.err (!%p956_p1)
}
  0x40   :  { %94 = dma.hbm_to_vmem [thread:$0]  %s1149_s7, 1024, %s89_s11, [#allocation12], %s992_s14, %s992_s14, %s993_s15  }
  0x41   :  { %980 = dma.done.wait [#allocation3], 128  }
  0x42   :  { %981 = vsyncadd [#allocation3], 4294967168 }
  0x43   :  { %982 = dma.done.wait [#allocation6], 1152  }
  0x44   :  { %983 = vsyncadd [#allocation6], 4294966144 }
  0x45   :  { %984 = dma.done.wait [#allocation9], 2048  }
  0x46   :  { %985 = vsyncadd [#allocation9], 4294965248 }
  0x47   :  { %986 = dma.done.wait [#allocation12], 1024  }
  0x48   :  { %987 = vsyncadd [#allocation12], 4294966272  ;;  %v998_v0 = vmov 0.0   ;;  %vm999_vm0 = vmmov 0   ;;  %v798_v1 = vld [vmem:[#allocation8 + $0x38] sm:$0xff]   ;;  %v800_v3 = vld [vmem:[#allocation8 + $0x30] sm:$0xff]  }
  0x49   :  { %707 = vmatprep.subr.bf16.mxu0 %v998_v0  ;;  %727 = vmatprep.subr.bf16.mxu1 %v998_v0  ;;  %v799_v2 = vld [vmem:[#allocation7 + $0x38] sm:$0xff]   ;;  %v801_v4 = vld [vmem:[#allocation7 + $0x30] sm:$0xff]   ;;  %v802_v5 = vld [vmem:[#allocation8 + $0x28] sm:$0xff]  }
  0x4a   :  { %723 = vmatprep.mubr.msk.bf16.mxu0 %vm999_vm0, %v998_v0  ;;  %743 = vmatprep.mubr.msk.bf16.mxu1 %vm999_vm0, %v998_v0  ;;  %v803_v6 = vld [vmem:[#allocation7 + $0x28] sm:$0xff]   ;;  %v804_v7 = vld [vmem:[#allocation8 + $0x20] sm:$0xff]   ;;  %v806_v9 = vld [vmem:[#allocation8 + $0x18] sm:$0xff]  }
  0x4b   :  { %708 = vmatpush3.bf16.msra.mxu0 %v798_v1  ;;  %728 = vmatpush3.bf16.msra.mxu1 %v799_v2  ;;  %v805_v8 = vld [vmem:[#allocation7 + $0x20] sm:$0xff]   ;;  %v807_v10 = vld [vmem:[#allocation7 + $0x18] sm:$0xff]   ;;  %v808_v11 = vld [vmem:[#allocation8 + $0x10] sm:$0xff]  }
  0x4c   :  { %709 = vmatprep.subr.bf16.mxu0 %v998_v0  ;;  %729 = vmatprep.subr.bf16.mxu1 %v998_v0  ;;  %v809_v12 = vld [vmem:[#allocation7 + $0x10] sm:$0xff]   ;;  %v810_v13 = vld [vmem:[#allocation8 + $0x8] sm:$0xff]   ;;  %v812_v15 = vld [vmem:[#allocation8] sm:$0xff]  }
  0x4d   :  { %v811_v14 = vld [vmem:[#allocation7 + $0x8] sm:$0xff]   ;;  %v813_v16 = vld [vmem:[#allocation7] sm:$0xff]   ;;  %v814_v17 = vld [vmem:[#allocation5] sm:$0xff]  }
  0x4e   :  { %v815_v18 = vld [vmem:[#allocation2] sm:$0xff]   ;;  %v816_v19 = vld [vmem:[#allocation10 + $0x38] sm:$0xff]   ;;  %v818_v21 = vld [vmem:[#allocation10 + $0x28] sm:$0xff]  }
  0x4f   :  { %710 = vmatpush3.bf16.msra.mxu0 %v800_v3  ;;  %730 = vmatpush3.bf16.msra.mxu1 %v801_v4  ;;  %v817_v20 = vld [vmem:[#allocation10 + $0x30] sm:$0xff]   ;;  %v819_v22 = vld [vmem:[#allocation10 + $0x20] sm:$0xff]   ;;  %v820_v23 = vld [vmem:[#allocation10 + $0x18] sm:$0xff]  }
  0x50   :  { %711 = vmatprep.subr.bf16.mxu0 %v998_v0  ;;  %731 = vmatprep.subr.bf16.mxu1 %v998_v0  ;;  %v821_v24 = vld [vmem:[#allocation10 + $0x10] sm:$0xff]   ;;  %v822_v25 = vld [vmem:[#allocation10 + $0x8] sm:$0xff]   ;;  %v823_v26 = vld [vmem:[#allocation10] sm:$0xff]  }
  0x51   :  { %v824_v27 = vld [vmem:[#allocation11 + $0x38] sm:$0xff]   ;;  %v825_v28 = vld [vmem:[#allocation11 + $0x30] sm:$0xff]   ;;  %v826_v29 = vld [vmem:[#allocation11 + $0x28] sm:$0xff]  }
  0x52   :  { %v827_v30 = vld [vmem:[#allocation11 + $0x20] sm:$0xff]   ;;  %v828_v31 = vld [vmem:[#allocation11 + $0x18] sm:$0xff]   ;;  %v641_v36 = vld [vmem:[%s1146_s4] ss:$0 sm:$0xff] }
  0x53   :  { %712 = vmatpush3.bf16.msra.mxu0 %v802_v5  ;;  %732 = vmatpush3.bf16.msra.mxu1 %v803_v6  ;;  %v829_v48 = vld [vmem:[#allocation11 + $0x10] sm:$0xff]   ;;  %v830_v49 = vld [vmem:[#allocation11 + $0x8] sm:$0xff]   ;;  %v831_v50 = vld [vmem:[#allocation11] sm:$0xff]  }
  0x54   :  { %713 = vmatprep.subr.bf16.mxu0 %v998_v0  ;;  %733 = vmatprep.subr.bf16.mxu1 %v998_v0  ;;  %v642_v51 = vld [vmem:[%s1148_s6] ss:$0 sm:$0xff]  ;;  %s1000_s6 = smov [#allocation13]  }
  0x55   :  { %v651_v61 = vld [vmem:[%s1150_s8] ss:$0 sm:$0xff]  ;;  %s608_s21 = sshll.u32 %s1000_s6, 4  ;;  %s609_s21 = int_to_ptr.vmem [resolvable:$true] %s608_s21 }
  0x56   :  { %s960_s8 = scalar_lea.vmem %s609_s21, 128  ;;  %p965_p3 = scmp.lt.s32.totalorder %s609_s21, %s609_s21 }
  0x57   :  { %714 = vmatpush3.bf16.msra.mxu0 %v804_v7  ;;  %734 = vmatpush3.bf16.msra.mxu1 %v805_v8  ;;  %p961_p2 = scmp.ne.s32.totalorder %s609_s21, %s960_s8  ;;  %p966_p4 = scmp.lt.s32.totalorder %s960_s8, %s960_s8 }
  0x58   :  { %715 = vmatprep.subr.bf16.mxu0 %v998_v0  ;;  %735 = vmatprep.subr.bf16.mxu1 %v998_v0 }
  0x59   :  { %p967_p5 = por %p966_p4, %p965_p3 }
  0x5b   :  { %716 = vmatpush3.bf16.msra.mxu0 %v806_v9  ;;  %736 = vmatpush3.bf16.msra.mxu1 %v807_v10  ;;  %p968_p6 = pnand %p967_p5, %p961_p2 }
  0x5c   :  { %717 = vmatprep.subr.bf16.mxu0 %v998_v0  ;;  %737 = vmatprep.subr.bf16.mxu1 %v998_v0 }
  0x5f   :  { %718 = vmatpush3.bf16.msra.mxu0 %v808_v11  ;;  %738 = vmatpush3.bf16.msra.mxu1 %v809_v12 }
  0x60   :  { %719 = vmatprep.subr.bf16.mxu0 %v998_v0  ;;  %739 = vmatprep.subr.bf16.mxu1 %v998_v0 }
  0x63   :  { %720 = vmatpush3.bf16.msra.mxu0 %v810_v13  ;;  %740 = vmatpush3.bf16.msra.mxu1 %v811_v14 }
  0x64   :  { %721 = vmatprep.subr.bf16.mxu0 %v998_v0  ;;  %741 = vmatprep.subr.bf16.mxu1 %v998_v0 }
  0x67   :  { %722 = vmatpush3.bf16.msra.mxu0 %v812_v15  ;;  %742 = vmatpush3.bf16.msra.mxu1 %v813_v16 }
  0x68   :  { %747 = vmatprep.subr.bf16.mxu0 %v998_v0  ;;  %767 = vmatprep.subr.bf16.mxu1 %v998_v0 }
  0x6a   :  { %724 = vmatmul.mubr.bf16.vlgmr.msra.gmra.mxu0 %v814_v17  ;;  %744 = vmatmul.mubr.bf16.vlgmr.msra.gmra.mxu1 %v815_v18 }
  0x6b   :  { %748 = vmatpush3.bf16.msra.mxu0 %v816_v19  ;;  %763 = vmatprep.mubr.msk.bf16.mxu0 %vm999_vm0, %v998_v0 }
  0x6c   :  { %749 = vmatprep.subr.bf16.mxu0 %v998_v0  ;;  %783 = vmatprep.mubr.msk.bf16.mxu1 %vm999_vm0, %v998_v0 }
  0x6d   :  { %768 = vmatpush3.bf16.msra.mxu1 %v824_v27 }
  0x6e   :  { %769 = vmatprep.subr.bf16.mxu1 %v998_v0 }
  0x6f   :  { %750 = vmatpush3.bf16.msra.mxu0 %v817_v20 }
  0x70   :  { %751 = vmatprep.subr.bf16.mxu0 %v998_v0 }
  0x71   :  { %770 = vmatpush3.bf16.msra.mxu1 %v825_v28 }
  0x72   :  { %771 = vmatprep.subr.bf16.mxu1 %v998_v0 }
  0x73   :  { %752 = vmatpush3.bf16.msra.mxu0 %v818_v21 }
  0x74   :  { %753 = vmatprep.subr.bf16.mxu0 %v998_v0 }
  0x75   :  { %772 = vmatpush3.bf16.msra.mxu1 %v826_v29 }
  0x76   :  { %773 = vmatprep.subr.bf16.mxu1 %v998_v0 }
  0x77   :  { %754 = vmatpush3.bf16.msra.mxu0 %v819_v22 }
  0x78   :  { %755 = vmatprep.subr.bf16.mxu0 %v998_v0 }
  0x79   :  { %774 = vmatpush3.bf16.msra.mxu1 %v827_v30 }
  0x7a   :  { %775 = vmatprep.subr.bf16.mxu1 %v998_v0 }
  0x7b   :  { %756 = vmatpush3.bf16.msra.mxu0 %v820_v23 }
  0x7c   :  { %757 = vmatprep.subr.bf16.mxu0 %v998_v0 }
  0x7d   :  { %776 = vmatpush3.bf16.msra.mxu1 %v828_v31 }
  0x7e   :  { %777 = vmatprep.subr.bf16.mxu1 %v998_v0 }
  0x7f   :  { %758 = vmatpush3.bf16.msra.mxu0 %v821_v24 }
  0x80   :  { %759 = vmatprep.subr.bf16.mxu0 %v998_v0 }
  0x81   :  { %778 = vmatpush3.bf16.msra.mxu1 %v829_v48 }
  0x82   :  { %779 = vmatprep.subr.bf16.mxu1 %v998_v0 }
  0x83   :  { %760 = vmatpush3.bf16.msra.mxu0 %v822_v25 }
  0x84   :  { %761 = vmatprep.subr.bf16.mxu0 %v998_v0 }
  0x85   :  { %780 = vmatpush3.bf16.msra.mxu1 %v830_v49 }
  0x86   :  { %781 = vmatprep.subr.bf16.mxu1 %v998_v0 }
  0x87   :  { %762 = vmatpush3.bf16.msra.mxu0 %v823_v26 }
  0x89   :  { %782 = vmatpush3.bf16.msra.mxu1 %v831_v50 }
 0x12a   :  { %v240_v32 = vpop.f32.mrf.mxu0  ;;  %v335_v33 = vpop.f32.mrf.mxu1 }
 0x12b   :  { %v336_v34 = vadd.f32 %v335_v33, %v240_v32 }
 0x12c   :  { %v725_v35 = vpop.f32.mrf.mxu0  ;;  %v745_v37 = vpop.f32.mrf.mxu1 }
 0x12d   :  { %v349_v40 = vadd.f32 %v641_v36, %v336_v34 }
 0x12e   :  { %v243_v38 = vpop.f32.mrf.mxu0  ;;  %v338_v39 = vpop.f32.mrf.mxu1 }
 0x12f   :  { %v339_v41 = vadd.f32 %v338_v39, %v243_v38  ;;  %v351_v45 = vmax.f32 %v349_v40, 0.0 }
 0x130   :  { %v726_v42 = vpop.f32.mrf.mxu0  ;;  %v746_v43 = vpop.f32.mrf.mxu1 }
 0x131   :  { %v350_v44 = vadd.f32 %v641_v36, %v339_v41 }
 0x133   :  { %v352_v46 = vmax.f32 %v350_v44, 0.0 }
 0x135   :  { %v353_v47 = vpack.c.bf16 %v352_v46, %v351_v45 }
 0x137   :  { %764 = vmatmul.mubr.bf16.vlgmr.msra.gmra.mxu0 %v353_v47 }
 0x1f7   :  { %v459_v52 = vpop.f32.mrf.mxu0 }
 0x1f8   :  { %v460_v54 = vadd.f32 %v642_v51, %v459_v52 }
 0x1f9   :  { %v765_v53 = vpop.f32.mrf.mxu0 }
 0x1fa   :  { %v466_v58 = vmax.f32 %v460_v54, 0.0 }
 0x1fb   :  { %v462_v55 = vpop.f32.mrf.mxu0 }
 0x1fc   :  { %v463_v56 = vadd.f32 %v642_v51, %v462_v55 }
 0x1fd   :  { %v766_v57 = vpop.f32.mrf.mxu0 }
 0x1fe   :  { %v467_v59 = vmax.f32 %v463_v56, 0.0 }
 0x200   :  { %v468_v60 = vpack.c.bf16 %v467_v59, %v466_v58 }
 0x202   :  { %784 = vmatmul.mubr.bf16.vlgmr.msra.gmra.mxu1 %v468_v60 }
 0x2c2   :  { %v574_v62 = vpop.f32.mrf.mxu1 }
 0x2c3   :  { %v575_v63 = vadd.f32 %v651_v61, %v574_v62 }
 0x2c4   :  { %v785_v0 = vpop.f32.mrf.mxu1 }
 0x2c5   :  { %v660_v1 = vmul.f32 -1.442695, %v575_v63 }
 0x2c6   :  { %v577_v2 = vpop.f32.mrf.mxu1 }
 0x2c7   :  { %832 = vpow2.f32 %v660_v1  ;;  %v578_v3 = vadd.f32 %v651_v61, %v577_v2 }
 0x2c8   :  { %v786_v4 = vpop.f32.mrf.mxu1 }
 0x2c9   :  { %v661_v5 = vmul.f32 -1.442695, %v578_v3 }
 0x2cb   :  { %834 = vpow2.f32 %v661_v5 }
 0x2d4   :  { %v833_v6 = vpop.eup %832 }
 0x2d5   :  { %v587_v7 = vadd.f32 1.0, %v833_v6 }
 0x2d7   :  { %836 = vrcp.f32 %v587_v7 }
 0x2d8   :  { %v835_v8 = vpop.eup %834 }
 0x2d9   :  { %v588_v9 = vadd.f32 1.0, %v835_v8 }
 0x2db   :  { %838 = vrcp.f32 %v588_v9 }
 0x2e4   :  { %v837_v10 = vpop.eup %836 }
 0x2e8   :  { %v839_v11 = vpop.eup %838 }
 0x2e9   :  { %v669_v12 = vpack.c.bf16 %v839_v11, %v837_v10 }
 0x2eb   :  { %670 = vst [vmem:[#allocation13] sm:$0xff] %v669_v12  }
 0x2ec   :  { %971 = shalt.err (!%p968_p6)
}
 0x2ed   :  { %614 = dma.vmem_to_hbm [thread:$0]  %s609_s21, 128, %s1151_s9, [#allocation4], %s992_s14, %s992_s14, %s993_s15  }
 0x2ee   :  { %988 = dma.done.wait [#allocation4], 128  }
 0x2ef   :  { %989 = vsyncadd [#allocation4], 4294967168 }
 0x2f0   :  { %618 = vsyncpa [#allocation3], 1 }
 0x2f1   :  { %619 = vsyncpa [#allocation6], 1 }
 0x2f2   :  { %620 = vsyncpa [#allocation9], 1 }
 0x2f3   :  { %621 = vsyncpa [#allocation12], 1 }
 0x2f4   :  { %622 = vsyncpa [#allocation4], 1 }

// kernel: tpu_custom_call.1
= control target key start
LH: loop header
LB: loop body
LE: loop exit
PB: predicated region body
PF: predicated region fallthrough
CT: control target
= control target key end

     0   :  { %14 = vsyncpa [#allocation3], 0  ;;  %s1142_s0 = inlined_call_operand.hbm [shape: bf16[16,128], index: 0, kind: input, shape index: {}]   ;;  %s1143_s1 = inlined_call_operand.hbm [shape: bf16[16,128], index: 1, kind: input, shape index: {}]   ;;  %s1144_s2 = inlined_call_operand.hbm [shape: bf16[128,128], index: 2, kind: input, shape index: {}]   ;;  %s1145_s3 = inlined_call_operand.hbm [shape: bf16[128,128], index: 3, kind: input, shape index: {}]   ;;  %s1146_s4 = inlined_call_operand.vmem [shape: f32[1,128], index: 4, kind: input, shape index: {}]   ;;  %s1147_s5 = inlined_call_operand.hbm [shape: bf16[128,128], index: 5, kind: input, shape index: {}]   ;;  %s1148_s6 = inlined_call_operand.vmem [shape: f32[1,128], index: 6, kind: input, shape index: {}]   ;;  %s1149_s7 = inlined_call_operand.hbm [shape: bf16[128,128], index: 7, kind: input, shape index: {}]   ;;  %s1150_s8 = inlined_call_operand.vmem [shape: f32[1,128], index: 8, kind: input, shape index: {}]   ;;  %s1151_s9 = inlined_call_operand.hbm [shape: bf16[16,128], index: 9, kind: output, shape index: {}]  }
   0x1   :  { %15 = vsyncpa [#allocation6], 0 }
   0x2   :  { %16 = vsyncpa [#allocation9], 0 }
   0x3   :  { %17 = vsyncpa [#allocation12], 0 }
   0x4   :  { %18 = vsyncpa [#allocation4], 0  ;;  %s990_s30 = smov [#allocation5]   ;;  %s991_s11 = smov [#allocation8]  }
   0x5   :  { %s36_s10 = sshll.u32 %s990_s30, 4  ;;  %s60_s12 = sshll.u32 %s991_s11, 4  ;;  %s37_s10 = int_to_ptr.vmem [resolvable:$true] %s36_s10  ;;  %s61_s12 = int_to_ptr.vmem [resolvable:$true] %s60_s12 }
   0x6   :  { %s848_s13 = scalar_lea.vmem %s37_s10, 128  ;;  %p853_p1 = scmp.lt.s32.totalorder %s37_s10, %s37_s10 }
   0x7   :  { %p849_p0 = scmp.ne.s32.totalorder %s37_s10, %s848_s13  ;;  %p854_p2 = scmp.lt.s32.totalorder %s848_s13, %s848_s13 }
   0x9   :  { %p855_p3 = por %p854_p2, %p853_p1 }
   0xb   :  { %p856_p4 = pnand %p855_p3, %p849_p0 }
   0xd   :  { %859 = shalt.err (!%p856_p4)
}
   0xe   :  { %s992_s14 = smov 64   ;;  %s993_s15 = smov 4  }
   0xf   :  { %42 = dma.hbm_to_vmem [thread:$0]  %s1143_s1, 128, %s37_s10, [#allocation6], %s992_s14, %s992_s14, %s993_s15  }
  0x10   :  { %s868_s18 = scalar_lea.vmem %s61_s12, 1024  ;;  %p873_p6 = scmp.lt.s32.totalorder %s61_s12, %s61_s12 }
  0x11   :  { %p869_p5 = scmp.ne.s32.totalorder %s61_s12, %s868_s18  ;;  %p874_p7 = scmp.lt.s32.totalorder %s868_s18, %s868_s18 }
  0x13   :  { %p875_p8 = por %p874_p7, %p873_p6 }
  0x15   :  { %p876_p9 = pnand %p875_p8, %p869_p5 }
  0x17   :  { %879 = shalt.err (!%p876_p9)
}
  0x18   :  { %66 = dma.hbm_to_vmem [thread:$0]  %s1145_s3, 1024, %s61_s12, [#allocation9], %s992_s14, %s992_s14, %s993_s15  }
  0x19   :  { %s994_s21 = smov [#allocation2]   ;;  %s995_s23 = smov [#allocation7]  }
  0x1a   :  { %s24_s22 = sshll.u32 %s994_s21, 4  ;;  %s48_s24 = sshll.u32 %s995_s23, 4  ;;  %s25_s22 = int_to_ptr.vmem [resolvable:$true] %s24_s22  ;;  %s49_s24 = int_to_ptr.vmem [resolvable:$true] %s48_s24 }
  0x1b   :  { %s888_s1 = scalar_lea.vmem %s25_s22, 128  ;;  %p893_p11 = scmp.lt.s32.totalorder %s25_s22, %s25_s22 }
  0x1c   :  { %p889_p10 = scmp.ne.s32.totalorder %s25_s22, %s888_s1  ;;  %p894_p12 = scmp.lt.s32.totalorder %s888_s1, %s888_s1 }
  0x1e   :  { %p895_p13 = por %p894_p12, %p893_p11 }
  0x20   :  { %p896_p0 = pnand %p895_p13, %p889_p10 }
  0x22   :  { %899 = shalt.err (!%p896_p0)
}
  0x23   :  { %30 = dma.hbm_to_vmem [thread:$0]  %s1142_s0, 128, %s25_s22, [#allocation3], %s992_s14, %s992_s14, %s993_s15  }
  0x24   :  { %s908_s3 = scalar_lea.vmem %s49_s24, 1024  ;;  %p913_p2 = scmp.lt.s32.totalorder %s49_s24, %s49_s24 }
  0x25   :  { %p909_p1 = scmp.ne.s32.totalorder %s49_s24, %s908_s3  ;;  %p914_p3 = scmp.lt.s32.totalorder %s908_s3, %s908_s3 }
  0x27   :  { %p915_p4 = por %p914_p3, %p913_p2 }
  0x29   :  { %p916_p5 = pnand %p915_p4, %p909_p1 }
  0x2b   :  { %919 = shalt.err (!%p916_p5)
}
  0x2c   :  { %54 = dma.hbm_to_vmem [thread:$0]  %s1144_s2, 1024, %s49_s24, [#allocation6], %s992_s14, %s992_s14, %s993_s15  }
  0x2d   :  { %s996_s29 = smov [#allocation10]   ;;  %s997_s10 = smov [#allocation11]  }
  0x2e   :  { %s74_s30 = sshll.u32 %s996_s29, 4  ;;  %s88_s11 = sshll.u32 %s997_s10, 4  ;;  %s75_s30 = int_to_ptr.vmem [resolvable:$true] %s74_s30  ;;  %s89_s11 = int_to_ptr.vmem [resolvable:$true] %s88_s11 }
  0x2f   :  { %s928_s0 = scalar_lea.vmem %s75_s30, 1024  ;;  %p933_p7 = scmp.lt.s32.totalorder %s75_s30, %s75_s30 }
  0x30   :  { %p929_p6 = scmp.ne.s32.totalorder %s75_s30, %s928_s0  ;;  %p934_p8 = scmp.lt.s32.totalorder %s928_s0, %s928_s0 }
  0x32   :  { %p935_p9 = por %p934_p8, %p933_p7 }
  0x34   :  { %p936_p10 = pnand %p935_p9, %p929_p6 }
  0x36   :  { %939 = shalt.err (!%p936_p10)
}
  0x37   :  { %80 = dma.hbm_to_vmem [thread:$0]  %s1147_s5, 1024, %s75_s30, [#allocation9], %s992_s14, %s992_s14, %s993_s15  }
  0x38   :  { %s948_s2 = scalar_lea.vmem %s89_s11, 1024  ;;  %p953_p12 = scmp.lt.s32.totalorder %s89_s11, %s89_s11 }
  0x39   :  { %p949_p11 = scmp.ne.s32.totalorder %s89_s11, %s948_s2  ;;  %p954_p13 = scmp.lt.s32.totalorder %s948_s2, %s948_s2 }
  0x3b   :  { %p955_p0 = por %p954_p13, %p953_p12 }
  0x3d   :  { %p956_p1 = pnand %p955_p0, %p949_p11 }
  0x3f   :  { %959 = shalt.err (!%p956_p1)
}
  0x40   :  { %94 = dma.hbm_to_vmem [thread:$0]  %s1149_s7, 1024, %s89_s11, [#allocation12], %s992_s14, %s992_s14, %s993_s15  }
  0x41   :  { %980 = dma.done.wait [#allocation3], 128  }
  0x42   :  { %981 = vsyncadd [#allocation3], 4294967168 }
  0x43   :  { %982 = dma.done.wait [#allocation6], 1152  }
  0x44   :  { %983 = vsyncadd [#allocation6], 4294966144 }
  0x45   :  { %984 = dma.done.wait [#allocation9], 2048  }
  0x46   :  { %985 = vsyncadd [#allocation9], 4294965248 }
  0x47   :  { %986 = dma.done.wait [#allocation12], 1024  }
  0x48   :  { %987 = vsyncadd [#allocation12], 4294966272  ;;  %v998_v0 = vmov 0.0   ;;  %vm999_vm0 = vmmov 0   ;;  %v798_v1 = vld [vmem:[#allocation8 + $0x38] sm:$0xff]   ;;  %v800_v3 = vld [vmem:[#allocation8 + $0x30] sm:$0xff]  }
  0x49   :  { %707 = vmatprep.subr.bf16.mxu0 %v998_v0  ;;  %727 = vmatprep.subr.bf16.mxu1 %v998_v0  ;;  %v799_v2 = vld [vmem:[#allocation7 + $0x38] sm:$0xff]   ;;  %v801_v4 = vld [vmem:[#allocation7 + $0x30] sm:$0xff]   ;;  %v802_v5 = vld [vmem:[#allocation8 + $0x28] sm:$0xff]  }
  0x4a   :  { %723 = vmatprep.mubr.msk.bf16.mxu0 %vm999_vm0, %v998_v0  ;;  %743 = vmatprep.mubr.msk.bf16.mxu1 %vm999_vm0, %v998_v0  ;;  %v803_v6 = vld [vmem:[#allocation7 + $0x28] sm:$0xff]   ;;  %v804_v7 = vld [vmem:[#allocation8 + $0x20] sm:$0xff]   ;;  %v806_v9 = vld [vmem:[#allocation8 + $0x18] sm:$0xff]  }
  0x4b   :  { %708 = vmatpush3.bf16.msra.mxu0 %v798_v1  ;;  %728 = vmatpush3.bf16.msra.mxu1 %v799_v2  ;;  %v805_v8 = vld [vmem:[#allocation7 + $0x20] sm:$0xff]   ;;  %v807_v10 = vld [vmem:[#allocation7 + $0x18] sm:$0xff]   ;;  %v808_v11 = vld [vmem:[#allocation8 + $0x10] sm:$0xff]  }
  0x4c   :  { %709 = vmatprep.subr.bf16.mxu0 %v998_v0  ;;  %729 = vmatprep.subr.bf16.mxu1 %v998_v0  ;;  %v809_v12 = vld [vmem:[#allocation7 + $0x10] sm:$0xff]   ;;  %v810_v13 = vld [vmem:[#allocation8 + $0x8] sm:$0xff]   ;;  %v812_v15 = vld [vmem:[#allocation8] sm:$0xff]  }
  0x4d   :  { %v811_v14 = vld [vmem:[#allocation7 + $0x8] sm:$0xff]   ;;  %v813_v16 = vld [vmem:[#allocation7] sm:$0xff]   ;;  %v814_v17 = vld [vmem:[#allocation5] sm:$0xff]  }
  0x4e   :  { %v815_v18 = vld [vmem:[#allocation2] sm:$0xff]   ;;  %v816_v19 = vld [vmem:[#allocation10 + $0x38] sm:$0xff]   ;;  %v818_v21 = vld [vmem:[#allocation10 + $0x28] sm:$0xff]  }
  0x4f   :  { %710 = vmatpush3.bf16.msra.mxu0 %v800_v3  ;;  %730 = vmatpush3.bf16.msra.mxu1 %v801_v4  ;;  %v817_v20 = vld [vmem:[#allocation10 + $0x30] sm:$0xff]   ;;  %v819_v22 = vld [vmem:[#allocation10 + $0x20] sm:$0xff]   ;;  %v820_v23 = vld [vmem:[#allocation10 + $0x18] sm:$0xff]  }
  0x50   :  { %711 = vmatprep.subr.bf16.mxu0 %v998_v0  ;;  %731 = vmatprep.subr.bf16.mxu1 %v998_v0  ;;  %v821_v24 = vld [vmem:[#allocation10 + $0x10] sm:$0xff]   ;;  %v822_v25 = vld [vmem:[#allocation10 + $0x8] sm:$0xff]   ;;  %v823_v26 = vld [vmem:[#allocation10] sm:$0xff]  }
  0x51   :  { %v824_v27 = vld [vmem:[#allocation11 + $0x38] sm:$0xff]   ;;  %v825_v28 = vld [vmem:[#allocation11 + $0x30] sm:$0xff]   ;;  %v826_v29 = vld [vmem:[#allocation11 + $0x28] sm:$0xff]  }
  0x52   :  { %v827_v30 = vld [vmem:[#allocation11 + $0x20] sm:$0xff]   ;;  %v828_v31 = vld [vmem:[#allocation11 + $0x18] sm:$0xff]   ;;  %v641_v36 = vld [vmem:[%s1146_s4] ss:$0 sm:$0xff] }
  0x53   :  { %712 = vmatpush3.bf16.msra.mxu0 %v802_v5  ;;  %732 = vmatpush3.bf16.msra.mxu1 %v803_v6  ;;  %v829_v48 = vld [vmem:[#allocation11 + $0x10] sm:$0xff]   ;;  %v830_v49 = vld [vmem:[#allocation11 + $0x8] sm:$0xff]   ;;  %v831_v50 = vld [vmem:[#allocation11] sm:$0xff]  }
  0x54   :  { %713 = vmatprep.subr.bf16.mxu0 %v998_v0  ;;  %733 = vmatprep.subr.bf16.mxu1 %v998_v0  ;;  %v642_v51 = vld [vmem:[%s1148_s6] ss:$0 sm:$0xff]  ;;  %s1000_s6 = smov [#allocation13]  }
  0x55   :  { %v651_v61 = vld [vmem:[%s1150_s8] ss:$0 sm:$0xff]  ;;  %s608_s21 = sshll.u32 %s1000_s6, 4  ;;  %s609_s21 = int_to_ptr.vmem [resolvable:$true] %s608_s21 }
  0x56   :  { %s960_s8 = scalar_lea.vmem %s609_s21, 128  ;;  %p965_p3 = scmp.lt.s32.totalorder %s609_s21, %s609_s21 }
  0x57   :  { %714 = vmatpush3.bf16.msra.mxu0 %v804_v7  ;;  %734 = vmatpush3.bf16.msra.mxu1 %v805_v8  ;;  %p961_p2 = scmp.ne.s32.totalorder %s609_s21, %s960_s8  ;;  %p966_p4 = scmp.lt.s32.totalorder %s960_s8, %s960_s8 }
  0x58   :  { %715 = vmatprep.subr.bf16.mxu0 %v998_v0  ;;  %735 = vmatprep.subr.bf16.mxu1 %v998_v0 }
  0x59   :  { %p967_p5 = por %p966_p4, %p965_p3 }
  0x5b   :  { %716 = vmatpush3.bf16.msra.mxu0 %v806_v9  ;;  %736 = vmatpush3.bf16.msra.mxu1 %v807_v10  ;;  %p968_p6 = pnand %p967_p5, %p961_p2 }
  0x5c   :  { %717 = vmatprep.subr.bf16.mxu0 %v998_v0  ;;  %737 = vmatprep.subr.bf16.mxu1 %v998_v0 }
  0x5f   :  { %718 = vmatpush3.bf16.msra.mxu0 %v808_v11  ;;  %738 = vmatpush3.bf16.msra.mxu1 %v809_v12 }
  0x60   :  { %719 = vmatprep.subr.bf16.mxu0 %v998_v0  ;;  %739 = vmatprep.subr.bf16.mxu1 %v998_v0 }
  0x63   :  { %720 = vmatpush3.bf16.msra.mxu0 %v810_v13  ;;  %740 = vmatpush3.bf16.msra.mxu1 %v811_v14 }
  0x64   :  { %721 = vmatprep.subr.bf16.mxu0 %v998_v0  ;;  %741 = vmatprep.subr.bf16.mxu1 %v998_v0 }
  0x67   :  { %722 = vmatpush3.bf16.msra.mxu0 %v812_v15  ;;  %742 = vmatpush3.bf16.msra.mxu1 %v813_v16 }
  0x68   :  { %747 = vmatprep.subr.bf16.mxu0 %v998_v0  ;;  %767 = vmatprep.subr.bf16.mxu1 %v998_v0 }
  0x6a   :  { %724 = vmatmul.mubr.bf16.vlgmr.msra.gmra.mxu0 %v814_v17  ;;  %744 = vmatmul.mubr.bf16.vlgmr.msra.gmra.mxu1 %v815_v18 }
  0x6b   :  { %748 = vmatpush3.bf16.msra.mxu0 %v816_v19  ;;  %763 = vmatprep.mubr.msk.bf16.mxu0 %vm999_vm0, %v998_v0 }
  0x6c   :  { %749 = vmatprep.subr.bf16.mxu0 %v998_v0  ;;  %783 = vmatprep.mubr.msk.bf16.mxu1 %vm999_vm0, %v998_v0 }
  0x6d   :  { %768 = vmatpush3.bf16.msra.mxu1 %v824_v27 }
  0x6e   :  { %769 = vmatprep.subr.bf16.mxu1 %v998_v0 }
  0x6f   :  { %750 = vmatpush3.bf16.msra.mxu0 %v817_v20 }
  0x70   :  { %751 = vmatprep.subr.bf16.mxu0 %v998_v0 }
  0x71   :  { %770 = vmatpush3.bf16.msra.mxu1 %v825_v28 }
  0x72   :  { %771 = vmatprep.subr.bf16.mxu1 %v998_v0 }
  0x73   :  { %752 = vmatpush3.bf16.msra.mxu0 %v818_v21 }
  0x74   :  { %753 = vmatprep.subr.bf16.mxu0 %v998_v0 }
  0x75   :  { %772 = vmatpush3.bf16.msra.mxu1 %v826_v29 }
  0x76   :  { %773 = vmatprep.subr.bf16.mxu1 %v998_v0 }
  0x77   :  { %754 = vmatpush3.bf16.msra.mxu0 %v819_v22 }
  0x78   :  { %755 = vmatprep.subr.bf16.mxu0 %v998_v0 }
  0x79   :  { %774 = vmatpush3.bf16.msra.mxu1 %v827_v30 }
  0x7a   :  { %775 = vmatprep.subr.bf16.mxu1 %v998_v0 }
  0x7b   :  { %756 = vmatpush3.bf16.msra.mxu0 %v820_v23 }
  0x7c   :  { %757 = vmatprep.subr.bf16.mxu0 %v998_v0 }
  0x7d   :  { %776 = vmatpush3.bf16.msra.mxu1 %v828_v31 }
  0x7e   :  { %777 = vmatprep.subr.bf16.mxu1 %v998_v0 }
  0x7f   :  { %758 = vmatpush3.bf16.msra.mxu0 %v821_v24 }
  0x80   :  { %759 = vmatprep.subr.bf16.mxu0 %v998_v0 }
  0x81   :  { %778 = vmatpush3.bf16.msra.mxu1 %v829_v48 }
  0x82   :  { %779 = vmatprep.subr.bf16.mxu1 %v998_v0 }
  0x83   :  { %760 = vmatpush3.bf16.msra.mxu0 %v822_v25 }
  0x84   :  { %761 = vmatprep.subr.bf16.mxu0 %v998_v0 }
  0x85   :  { %780 = vmatpush3.bf16.msra.mxu1 %v830_v49 }
  0x86   :  { %781 = vmatprep.subr.bf16.mxu1 %v998_v0 }
  0x87   :  { %762 = vmatpush3.bf16.msra.mxu0 %v823_v26 }
  0x89   :  { %782 = vmatpush3.bf16.msra.mxu1 %v831_v50 }
 0x12a   :  { %v240_v32 = vpop.f32.mrf.mxu0  ;;  %v335_v33 = vpop.f32.mrf.mxu1 }
 0x12b   :  { %v336_v34 = vadd.f32 %v335_v33, %v240_v32 }
 0x12c   :  { %v725_v35 = vpop.f32.mrf.mxu0  ;;  %v745_v37 = vpop.f32.mrf.mxu1 }
 0x12d   :  { %v349_v40 = vadd.f32 %v641_v36, %v336_v34 }
 0x12e   :  { %v243_v38 = vpop.f32.mrf.mxu0  ;;  %v338_v39 = vpop.f32.mrf.mxu1 }
 0x12f   :  { %v339_v41 = vadd.f32 %v338_v39, %v243_v38  ;;  %v351_v45 = vmax.f32 %v349_v40, 0.0 }
 0x130   :  { %v726_v42 = vpop.f32.mrf.mxu0  ;;  %v746_v43 = vpop.f32.mrf.mxu1 }
 0x131   :  { %v350_v44 = vadd.f32 %v641_v36, %v339_v41 }
 0x133   :  { %v352_v46 = vmax.f32 %v350_v44, 0.0 }
 0x135   :  { %v353_v47 = vpack.c.bf16 %v352_v46, %v351_v45 }
 0x137   :  { %764 = vmatmul.mubr.bf16.vlgmr.msra.gmra.mxu0 %v353_v47 }
 0x1f7   :  { %v459_v52 = vpop.f32.mrf.mxu0 }
 0x1f8   :  { %v460_v54 = vadd.f32 %v642_v51, %v459_v52 }
 0x1f9   :  { %v765_v53 = vpop.f32.mrf.mxu0 }
 0x1fa   :  { %v466_v58 = vmax.f32 %v460_v54, 0.0 }
 0x1fb   :  { %v462_v55 = vpop.f32.mrf.mxu0 }
 0x1fc   :  { %v463_v56 = vadd.f32 %v642_v51, %v462_v55 }
 0x1fd   :  { %v766_v57 = vpop.f32.mrf.mxu0 }
 0x1fe   :  { %v467_v59 = vmax.f32 %v463_v56, 0.0 }
 0x200   :  { %v468_v60 = vpack.c.bf16 %v467_v59, %v466_v58 }
 0x202   :  { %784 = vmatmul.mubr.bf16.vlgmr.msra.gmra.mxu1 %v468_v60 }
 0x2c2   :  { %v574_v62 = vpop.f32.mrf.mxu1 }
 0x2c3   :  { %v575_v63 = vadd.f32 %v651_v61, %v574_v62 }
 0x2c4   :  { %v785_v0 = vpop.f32.mrf.mxu1 }
 0x2c5   :  { %v660_v1 = vmul.f32 -1.442695, %v575_v63 }
 0x2c6   :  { %v577_v2 = vpop.f32.mrf.mxu1 }
 0x2c7   :  { %832 = vpow2.f32 %v660_v1  ;;  %v578_v3 = vadd.f32 %v651_v61, %v577_v2 }
 0x2c8   :  { %v786_v4 = vpop.f32.mrf.mxu1 }
 0x2c9   :  { %v661_v5 = vmul.f32 -1.442695, %v578_v3 }
 0x2cb   :  { %834 = vpow2.f32 %v661_v5 }
 0x2d4   :  { %v833_v6 = vpop.eup %832 }
 0x2d5   :  { %v587_v7 = vadd.f32 1.0, %v833_v6 }
 0x2d7   :  { %836 = vrcp.f32 %v587_v7 }
 0x2d8   :  { %v835_v8 = vpop.eup %834 }
 0x2d9   :  { %v588_v9 = vadd.f32 1.0, %v835_v8 }
 0x2db   :  { %838 = vrcp.f32 %v588_v9 }
 0x2e4   :  { %v837_v10 = vpop.eup %836 }
 0x2e8   :  { %v839_v11 = vpop.eup %838 }
 0x2e9   :  { %v669_v12 = vpack.c.bf16 %v839_v11, %v837_v10 }
 0x2eb   :  { %670 = vst [vmem:[#allocation13] sm:$0xff] %v669_v12  }
 0x2ec   :  { %971 = shalt.err (!%p968_p6)
}
 0x2ed   :  { %614 = dma.vmem_to_hbm [thread:$0]  %s609_s21, 128, %s1151_s9, [#allocation4], %s992_s14, %s992_s14, %s993_s15  }
 0x2ee   :  { %988 = dma.done.wait [#allocation4], 128  }
 0x2ef   :  { %989 = vsyncadd [#allocation4], 4294967168 }
 0x2f0   :  { %618 = vsyncpa [#allocation3], 1 }
 0x2f1   :  { %619 = vsyncpa [#allocation6], 1 }
 0x2f2   :  { %620 = vsyncpa [#allocation9], 1 }
 0x2f3   :  { %621 = vsyncpa [#allocation12], 1 }
 0x2f4   :  { %622 = vsyncpa [#allocation4], 1 }

</bundles_post_ra>
